<compile_context>
chip_gen: v7x
topology: tpu7x:2x2x1
jax: 0.10.0
libtpu: 0.0.40
codegen_flags: <defaults>
</compile_context>

<pallas_src>
import functools

import jax
import jax.numpy as jnp
import numpy as np
from jax import lax
from jax.experimental import pallas as pl
from jax.experimental.pallas import tpu as pltpu


def _shift_crop_kernel(shift_ref, x_ref, out_ref, *, pad):
    """One grid step: clamped-crop `block_n` samples of the pipelined block."""
    block_n, c, h, w = out_ref.shape
    base = pl.program_id(0) * block_n

    # Static 2-D iotas (shared by every sample in the block).
    row_i = lax.broadcasted_iota(jnp.int32, (h, h), 0)   # output row index i
    row_k = lax.broadcasted_iota(jnp.int32, (h, h), 1)   # source row index k
    col_k = lax.broadcasted_iota(jnp.int32, (w, w), 0)   # source col index k
    col_j = lax.broadcasted_iota(jnp.int32, (w, w), 1)   # output col index j

    for b in range(block_n):                              # block_n is small & static
        idx = base + b
        dx = shift_ref[idx, 0] - pad                      # column shift (grid[..., 0])
        dy = shift_ref[idx, 1] - pad                      # row shift    (grid[..., 1])

        # 0/1 selection matrices implementing the clamped integer shift.
        #   P_row[i, k] = (k == clamp(i + dy, 0, h-1))
        #   P_col[k, j] = (k == clamp(j + dx, 0, w-1))
        p_row = (row_k == jnp.clip(row_i + dy, 0, h - 1)).astype(jnp.float32)
        p_col = (col_k == jnp.clip(col_j + dx, 0, w - 1)).astype(jnp.float32)

        img = x_ref[b].astype(jnp.float32)                # (c, h, w), cast in VMEM

        # Column clamp-shift: one (c*h, w) @ (w, w) matmul on the idle MXU.
        colshift = jnp.dot(img.reshape(c * h, w), p_col,
                           preferred_element_type=jnp.float32).reshape(c, h, w)
        # Row clamp-shift: batched (h, h) @ (h, w) matmuls over channels.
        p_row_b = jnp.broadcast_to(p_row[None], (c, h, h))
        rowshift = jnp.einsum('chk,ckw->chw', p_row_b, colshift,
                              preferred_element_type=jnp.float32)

        out_ref[b] = rowshift.astype(out_ref.dtype)


def _round_up(v, m):
    return -(-v // m) * m


def _pick_block_n(n, c, h, w, in_itemsize, max_block_n, vmem_budget_bytes):
    """Largest block_n under the VMEM budget (lane/sublane-padded footprint)."""
    hh = _round_up(h, 8)
    ww = _round_up(w, 128)
    # input block (native dtype) + f32 output block, per sample, per buffer.
    per_sample = c * hh * ww * (in_itemsize + 4)
    by_vmem = max(1, vmem_budget_bytes // (2 * per_sample))   # x2 double-buffering
    block_n = max(1, min(max_block_n, n, by_vmem))
    # Keep grid length >= 2 so both v7x TensorCores (and the pipeline) get work.
    if n > 1:
        block_n = min(block_n, (n + 1) // 2)
    return int(block_n), int(per_sample)


def random_shifts_aug(x, pad, key, *, max_block_n=8,
                      vmem_budget_bytes=12 * 1024 * 1024):
    """Pallas implementation of RandomShiftsAug.forward (x: NCHW), returns f32."""
    n, c, h, w = x.shape
    assert h == w, "RandomShiftsAug expects square images"

    # Integer shifts in [0, 2*pad], matching torch.randint(0, 2*pad + 1).
    # TODO(synk): jax.random does not reproduce torch.randint's stream; the
    # augmentation is statistically (not sample-for-sample) equivalent.
    shift = jax.random.randint(key, (n, 2), 0, 2 * pad + 1, dtype=jnp.int32)

    block_n, per_sample = _pick_block_n(
        n, c, h, w, jnp.dtype(x.dtype).itemsize, max_block_n, vmem_budget_bytes)
    num_blocks = pl.cdiv(n, block_n)

    # Pad the scalar-prefetch table so the tail block reads in-range SMEM
    # (the in-kernel clamp keeps any value safe regardless).
    n_pad_rows = num_blocks * block_n - n
    if n_pad_rows:
        shift = jnp.concatenate(
            [shift, jnp.zeros((n_pad_rows, 2), jnp.int32)], axis=0)

    # Explicit scoped-VMEM request sized from the block (safe on v5e/v6e/v7x).
    vmem_limit = int(min(max(4 * block_n * per_sample + (2 << 20), 16 << 20),
                         32 << 20))

    kernel = functools.partial(_shift_crop_kernel, pad=pad)

    out = pl.pallas_call(
        kernel,
        out_shape=jax.ShapeDtypeStruct((n, c, h, w), jnp.float32),
        grid_spec=pltpu.PrefetchScalarGridSpec(
            num_scalar_prefetch=1,                               # shift -> SMEM
            grid=(num_blocks,),
            in_specs=[pl.BlockSpec((block_n, c, h, w),
                                   lambda i, shift_ref: (i, 0, 0, 0))],
            out_specs=pl.BlockSpec((block_n, c, h, w),
                                   lambda i, shift_ref: (i, 0, 0, 0)),
        ),
        compiler_params=pltpu.CompilerParams(
            dimension_semantics=("parallel",),
            vmem_limit_bytes=vmem_limit,
        ),
    )(shift, x)
    return out


if __name__ == "__main__":
    pad = 4
    N, C, H, W = 2, 4, 16, 16

    key = jax.random.PRNGKey(0)
    xkey, skey = jax.random.split(key)
    x = jax.random.normal(xkey, (N, C, H, W), dtype=jnp.float32)
    # Make values exactly bf16-representable so the MXU selection matmuls are
    # bit-exact irrespective of the f32-matmul pass count.
    x = x.astype(jnp.bfloat16).astype(jnp.float32)

    out = jax.block_until_ready(random_shifts_aug(x, pad, skey))

    # Pure-numpy reference: with integer shifts, grid_sample is an exact
    # integer-pixel crop of the replicate-padded image.
    shift = np.asarray(
        jax.random.randint(skey, (N, 2), 0, 2 * pad + 1, dtype=jnp.int32))
    padded = np.pad(np.asarray(x), ((0, 0), (0, 0), (pad, pad), (pad, pad)),
                    mode="edge")
    ref = np.stack([
        padded[i, :, shift[i, 1]:shift[i, 1] + H, shift[i, 0]:shift[i, 0] + W]
        for i in range(N)
    ])
    np.testing.assert_allclose(np.asarray(out), ref, atol=1e-6, rtol=1e-6)

    print("KERNEL_OK")
</pallas_src>

<mosaic_0001>
module attributes {stable_mosaic.version = 11 : i64} {
  func.func @_shift_crop_kernel(%arg0: i32, %arg1: memref<2x2xi32, #tpu.memory_space<smem>>, %arg2: memref<1x4x16x16xf32, #tpu.memory_space<vmem>>, %arg3: memref<1x4x16x16xf32, #tpu.memory_space<vmem>>) attributes {dimension_semantics = [#tpu.dimension_semantics<parallel>], iteration_bounds = array<i64: 2>, scalar_prefetch = 1 : i64, scratch_operands = 0 : i64, tpu.core_type = #tpu.core_type<tc>, window_params = [{transform_indices = @transform_0, window_bounds = array<i64: 1, 4, 16, 16>}, {transform_indices = @transform_1, window_bounds = array<i64: 1, 4, 16, 16>}]} {
    %c1_i32 = arith.constant 1 : i32
    %0 = arith.muli %arg0, %c1_i32 : i32
    %1 = tpu.iota {dimensions = array<i32: 0>} : vector<16x16xi32>
    %2 = tpu.iota {dimensions = array<i32: 1>} : vector<16x16xi32>
    %3 = tpu.iota {dimensions = array<i32: 0>} : vector<16x16xi32>
    %4 = tpu.iota {dimensions = array<i32: 1>} : vector<16x16xi32>
    %c0_i32 = arith.constant 0 : i32
    %5 = arith.addi %0, %c0_i32 : i32
    %6 = arith.index_cast %5 : i32 to index
    %c0 = arith.constant 0 : index
    %7 = memref.load %arg1[%6, %c0] : memref<2x2xi32, #tpu.memory_space<smem>>
    %c4_i32 = arith.constant 4 : i32
    %8 = arith.subi %7, %c4_i32 : i32
    %9 = arith.index_cast %5 : i32 to index
    %c1 = arith.constant 1 : index
    %10 = memref.load %arg1[%9, %c1] : memref<2x2xi32, #tpu.memory_space<smem>>
    %c4_i32_0 = arith.constant 4 : i32
    %11 = arith.subi %10, %c4_i32_0 : i32
    %12 = vector.broadcast %11 : i32 to vector<16x16xi32>
    %13 = arith.addi %1, %12 : vector<16x16xi32>
    %c0_i32_1 = arith.constant 0 : i32
    %c15_i32 = arith.constant 15 : i32
    %14 = vector.broadcast %c0_i32_1 : i32 to vector<16x16xi32>
    %15 = arith.maxsi %14, %13 : vector<16x16xi32>
    %16 = vector.broadcast %c15_i32 : i32 to vector<16x16xi32>
    %17 = arith.minsi %16, %15 : vector<16x16xi32>
    %18 = arith.cmpi eq, %2, %17 : vector<16x16xi32>
    %19 = arith.extui %18 : vector<16x16xi1> to vector<16x16xi32>
    %20 = arith.sitofp %19 : vector<16x16xi32> to vector<16x16xf32>
    %21 = vector.broadcast %8 : i32 to vector<16x16xi32>
    %22 = arith.addi %4, %21 : vector<16x16xi32>
    %c0_i32_2 = arith.constant 0 : i32
    %c15_i32_3 = arith.constant 15 : i32
    %23 = vector.broadcast %c0_i32_2 : i32 to vector<16x16xi32>
    %24 = arith.maxsi %23, %22 : vector<16x16xi32>
    %25 = vector.broadcast %c15_i32_3 : i32 to vector<16x16xi32>
    %26 = arith.minsi %25, %24 : vector<16x16xi32>
    %27 = arith.cmpi eq, %3, %26 : vector<16x16xi32>
    %28 = arith.extui %27 : vector<16x16xi1> to vector<16x16xi32>
    %29 = arith.sitofp %28 : vector<16x16xi32> to vector<16x16xf32>
    %c0_4 = arith.constant 0 : index
    %c0_5 = arith.constant 0 : index
    %c0_6 = arith.constant 0 : index
    %c0_7 = arith.constant 0 : index
    %30 = vector.load %arg2[%c0_4, %c0_5, %c0_6, %c0_7] : memref<1x4x16x16xf32, #tpu.memory_space<vmem>>, vector<1x4x16x16xf32>
    %31 = vector.shape_cast %30 : vector<1x4x16x16xf32> to vector<4x16x16xf32>
    %32 = vector.shape_cast %31 : vector<4x16x16xf32> to vector<64x16xf32>
    %cst = arith.constant dense<0.000000e+00> : vector<64x16xf32>
    %33 = tpu.matmul %32, %29, %cst {dimension_numbers = #tpu.dot_dimension_numbers<[1], [0], [0], [1], [0, 0, 1, 1], [], []>} : vector<64x16xf32>, vector<16x16xf32>, vector<64x16xf32> -> vector<64x16xf32>
    %34 = vector.shape_cast %33 : vector<64x16xf32> to vector<4x16x16xf32>
    %35 = vector.shape_cast %20 : vector<16x16xf32> to vector<1x16x16xf32>
    %36 = vector.shape_cast %35 : vector<1x16x16xf32> to vector<1x16x16xf32>
    %37 = vector.broadcast %36 : vector<1x16x16xf32> to vector<4x16x16xf32>
    "tpu.trace_start"() <{level = 10 : i32, message = "chk,ckw->chw"}> : () -> ()
    %cst_8 = arith.constant dense<0.000000e+00> : vector<4x16x16xf32>
    %38 = tpu.matmul %37, %34, %cst_8 {dimension_numbers = #tpu.dot_dimension_numbers<[2], [1], [1], [2], [0, 0, 0, 1, 1, 2], [0], [0]>} : vector<4x16x16xf32>, vector<4x16x16xf32>, vector<4x16x16xf32> -> vector<4x16x16xf32>
    "tpu.trace_stop"() : () -> ()
    %c0_9 = arith.constant 0 : index
    %c0_10 = arith.constant 0 : index
    %c0_11 = arith.constant 0 : index
    %c0_12 = arith.constant 0 : index
    %39 = vector.load %arg3[%c0_9, %c0_10, %c0_11, %c0_12] : memref<1x4x16x16xf32, #tpu.memory_space<vmem>>, vector<1x4x16x16xf32>
    %40 = vector.shape_cast %39 : vector<1x4x16x16xf32> to vector<4x16x16xf32>
    %41 = vector.shape_cast %38 : vector<4x16x16xf32> to vector<1x4x16x16xf32>
    tpu.vector_store %arg3[%c0_9, %c0_10, %c0_11, %c0_12], %41 {strides = array<i32>} : memref<1x4x16x16xf32, #tpu.memory_space<vmem>>, vector<1x4x16x16xf32>,
    return
  }
  func.func @transform_0(%arg0: i32, %arg1: memref<2x2xi32, #tpu.memory_space<smem>>) -> (i32, i32, i32, i32) {
    %c0_i32 = arith.constant 0 : i32
    %c0_i32_0 = arith.constant 0 : i32
    %c0_i32_1 = arith.constant 0 : i32
    %c0_i32_2 = arith.constant 0 : i32
    return %arg0, %c0_i32, %c0_i32_0, %c0_i32_1 : i32, i32, i32, i32
  }
  func.func @transform_1(%arg0: i32, %arg1: memref<2x2xi32, #tpu.memory_space<smem>>) -> (i32, i32, i32, i32) {
    %c0_i32 = arith.constant 0 : i32
    %c0_i32_0 = arith.constant 0 : i32
    %c0_i32_1 = arith.constant 0 : i32
    %c0_i32_2 = arith.constant 0 : i32
    return %arg0, %c0_i32, %c0_i32_0, %c0_i32_1 : i32, i32, i32, i32
  }
}

</mosaic_0001>

<bundles_post_ra>
// kernel: tpu_custom_call.1
= control target key start
LH: loop header
LB: loop body
LE: loop exit
PB: predicated region body
PF: predicated region fallthrough
CT: control target
= control target key end

     0   :  { %s1250_s0 = inlined_call_operand.hbm [shape: s32[2,2], index: 0, kind: input, shape index: {}]   ;;  %s1251_s1 = inlined_call_operand.hbm [shape: f32[2,4,16,16], index: 1, kind: input, shape index: {}]   ;;  %s1252_s2 = inlined_call_operand.hbm [shape: f32[2,4,16,16], index: 2, kind: output, shape index: {}]  }
   0x1   :  { %s903_s11 = scalar_lea.hbm %s1250_s0, 32 }
   0x2   :  { %p904_p0 = scmp.ne.s32.totalorder %s1250_s0, %s903_s11  ;;  %p907_p1 = scmp.lt.u32.totalorder %s903_s11, %s1250_s0 }
   0x4   :  { %p909_p2 = pnand %p907_p1, %p904_p0 }
   0x6   :  { %912 = shalt.err (!%p909_p2)  }
   0x7   :  { %s1013_s16 = smov [#allocation3]  }
   0x8   :  { %8 = dma.hbm_to_smem %s1250_s0, 32, %s1013_s16, [#allocation2] }
   0x9   :  { %987 = dma.done.wait [#allocation2], 32 }
   0xa   :  { %988 = vsyncadd [#allocation2], 4294967264 }
   0xb   :  { %10 = sfence }
   0xc   :  { %11 = vsyncpa [#allocation5], 0 }
   0xd   :  { %13 = vsyncpa [#allocation5 + $0x1], 0 }
   0xe   :  { %14 = vsyncpa [#allocation6], 0 }
   0xf   :  { %16 = vsyncpa [#allocation6 + $0x1], 0  ;;  %s1049_s19 = smov 0   ;;  %s1051_s20 = smov 0  }
  0x10   :  { %s1053_s21 = smov 0   ;;  %s1055_s22 = smov 0  }
  0x11 LB: > { %s1070_s0 = sadd.s32 4294967295, %s1011_s22   ;;  %s719_s23 = sadd.s32 4294967294, %s1011_s22   ;;  %s1011_s22 = sphi %s1055_s22, %s1265_s22   ;;  %s1007_s21 = sphi %s1053_s21, %s1264_s21   ;;  %s1003_s20 = sphi %s1051_s20, %s1263_s20   ;;  %s999_s19 = sphi %s1049_s19, %s1262_s19  }
  0x12   : > { %s1074_s24 = sadd.s32 1, %s1011_s22   ;;  %s29_s25 = sadd.s32 1, %s1007_s21 }
  0x13   : > { %s26_s26 = ssub.s32 %s1011_s22, %s1074_s24  ;;  %p36_p3 = scmp.ne.s32.totalorder %s1007_s21, %s1003_s20 }
  0x14   : > { %p27_p4 = scmp.eq.s32.totalorder %s26_s26, 0  ;;  %p37_p5 = scmp.eq.s32.totalorder %s1011_s22, 0 }
  0x15   : > { %p42_p6 = scmp.ne.s32.totalorder %s1003_s20, %s999_s19  ;;  %p43_p7 = scmp.eq.s32.totalorder %s1070_s0, 0 }
  0x16   : > { %s1086_s27 = scalar_select %p27_p4, %s1007_s21, %s29_s25  }
  0x17   : > { %p1088_p8 = por %p37_p5, %p36_p3  ;;  %p1092_p9 = por %p43_p7, %p42_p6 }
  0x18   : > { %p66_p10 = scmp.eq.s32.totalorder %s1070_s0, 1  ;;  %p72_p11 = scmp.eq.s32.totalorder %s719_s23, 1 }
  0x19   : > { %p862_p13 = scmp.lt.s32.totalorder %s1011_s22, 2  ;;  %s92_s4 = sand.u32 1, %s1007_s21  }
  0x1a   : > { %p1099_p0 = por %p66_p10, %p36_p3  ;;  %p1103_p1 = por %p72_p11, %p42_p6 }
  0x1b   : > { %s758_s5 = sshll.u32 %s1011_s22, 10  ;;  %s722_s6 = sshll.u32 %s92_s4, 6 }
  0x1c   : > { %s1256_s30 = scalar_select %p1099_p0, 1, 0 }
  0x1d   : > { %s1257_s3 = scalar_select %p1103_p1, 1, 0 }
  0x1e   : > { %s1112_s9 = scalar_lea.hbm %s1251_s1, %s758_s5  ;;  %s96_s10 = scalar_lea.vmem [#allocation4], %s722_s6 }
  0x1f   : > { %s103_s11 = sshll.u32 %s96_s10, 4  ;;  %p1116_p2 = pnand %p862_p13, %p1088_p8  ;;  %s1120_s11 = int_to_ptr.vmem [resolvable:$true] %s103_s11 }
  0x20   : > { %s1122_s13 = scalar_lea.sflag [#allocation5], %s92_s4  ;;  %s913_s14 = scalar_lea.hbm %s1112_s9, 1024 }
  0x21   : > { %p914_p3 = scmp.ne.s32.totalorder %s1112_s9, %s913_s14  ;;  %p915_p4 = pneg %p1116_p2 }
  0x22   : > { %s918_s17 = scalar_lea.hbm %s1251_s1, 2048  ;;  %p919_p7 = scmp.lt.u32.totalorder %s1112_s9, %s1251_s1 }
  0x23   : > { %p916_p5 = pnand %p915_p4, %p914_p3  ;;  %p920_p8 = scmp.lt.u32.totalorder %s918_s17, %s913_s14 }
  0x24   : > { %p922_p11 = scmp.lt.u32.totalorder %s913_s14, %s1112_s9 }
  0x25   : > { %p917_p6 = pneg %p916_p5  ;;  %p921_p10 = por %p920_p8, %p919_p7 }
  0x27   : > { %p923_p13 = por %p922_p11, %p921_p10 }
  0x29   : > { %p924_p12 = pnand %p923_p13, %p917_p6 }
  0x2b   : > { %927 = shalt.err (!%p924_p12)
}
  0x2c   : > { %s928_s25 = scalar_lea.vmem %s1120_s11, 1024  ;;  %s1014_s26 = smov [#allocation4]  }
  0x2d   : > { %p929_p3 = scmp.ne.s32.totalorder %s1120_s11, %s928_s25  ;;  %s933_s28 = sshll.u32 %s1014_s26, 4  ;;  %s934_s28 = int_to_ptr.vmem [resolvable:$false] %s933_s28 }
  0x2e   : > { %s935_s4 = scalar_lea.vmem %s934_s28, 2048  ;;  %p936_p0 = scmp.lt.s32.totalorder %s1120_s11, %s934_s28 }
  0x2f   : > { %p931_p5 = pnand %p929_p3, %p915_p4  ;;  %p937_p7 = scmp.lt.s32.totalorder %s935_s4, %s928_s25 }
  0x31   : > { %p932_p1 = pneg %p931_p5  ;;  %p938_p8 = por %p937_p7, %p936_p0 }
  0x33   : > { %p939_p10 = pnand %p938_p8, %p932_p1 }
  0x35   : > { %942 = shalt.err (!%p939_p10)
}
  0x36   : > { %s1015_s5 = smov 128   ;;  %s1016_s6 = smov 8  }
  0x37   : > { %857 = dma.hbm_to_vmem [thread:$0]  (!%p1116_p2), %s1112_s9, 1024, %s1120_s11, %s1122_s13, %s1015_s5, %s1015_s5, %s1016_s6  }
  0x38   : > { %p725_p12 = scmp.ge.s32.totalorder %s1011_s22, 1  ;;  %p111_p4 = scmp.lt.s32.totalorder %s1011_s22, 3 }
  0x3a   : > { %p112_p6 = pnand %p725_p12, %p111_p4 }
  0x3b   : > { %s1153_s7 = sand.u32 (!%p112_p6), 1, %s1003_s20  }
  0x3c   : > { %115 = sbr.rel (%p112_p6) target bundleno = 548 (0x224), region = 24  ;;  %s726_s8 = sshll.u32 (!%p112_p6), %s1153_s7, 6 }
  0x3d   : > { %s118_s10 = scalar_lea.sflag (!%p112_p6), [#allocation5], %s1153_s7  ;;  %s1159_s14 = scalar_lea.vmem (!%p112_p6), [#allocation4], %s726_s8 }
  0x43   : > { %990 = dma.done.wait (%p1092_p9), %s118_s10, 1024  }
  0x44   : > { %992 = vsyncadd (%p1092_p9), %s118_s10, 4294966272  ;;  %s728_s9 = sshll.u32 %s1070_s0, 7  ;;  %v140_v0 = vlaneseq  ;;  %vm188_vm0 = vcmask 130048   ;;  %v180_v3 = vld [vmem:[%s1159_s14] sm:$0xff]  ;;  %v1017_v12 = vmov 1.0|1.0  }
  0x45   : > { %s146_s11 = sld [smem:[#allocation3 + %s728_s9]]  ;;  %s148_s12 = sadd.s32 1, %s728_s9  ;;  %790 = vmatprep.mubr.msk.f32.mxu0 %vm188_vm0, %v180_v3  ;;  %v181_v13 = vld [vmem:[%s1159_s14 + $0x8] sm:$0xff]  ;;  %v182_v14 = vld [vmem:[%s1159_s14 + $0x10] sm:$0xff]  ;;  %v183_v15 = vld [vmem:[%s1159_s14 + $0x18] sm:$0xff]  ;;  %v1018_v24 = vmov 0.0  }
  0x46   : > { %s149_s13 = sld [smem:[#allocation3 + %s148_s12]]  ;;  %v141_v1 = vshrl.u32 %v140_v0, 7  ;;  %v144_v2 = vand.u32 127, %v140_v0  ;;  %v184_v16 = vld [vmem:[%s1159_s14 + $0x20] sm:$0xff]  ;;  %v185_v17 = vld [vmem:[%s1159_s14 + $0x28] sm:$0xff]  ;;  %v186_v18 = vld [vmem:[%s1159_s14 + $0x30] sm:$0xff] }
  0x47   : > { %v187_v19 = vld [vmem:[%s1159_s14 + $0x38] sm:$0xff]  ;;  %s139_s29 = scalar_lea.vmem [#allocation7], %s726_s8  ;;  %s759_s18 = sshll.u32 %s1070_s0, 10 }
  0x48   : > { %v142_v4 = vadd.s32 8, %v141_v1  ;;  %s646_s17 = sshll.u32 %s139_s29, 4  ;;  %s1204_s26 = scalar_lea.hbm %s1252_s2, %s759_s18  ;;  %s1198_s17 = int_to_ptr.vmem [resolvable:$true] %s646_s17 }
  0x49   : > { %s633_s0 = scalar_lea.sflag [#allocation6], %s1153_s7  ;;  %s943_s28 = scalar_lea.vmem %s1198_s17, 1024 }
  0x4a   : > { %p944_p9 = scmp.ne.s32.totalorder %s1198_s17, %s943_s28  ;;  %p1259_p0 = scmp.ne.s32.totalorder %s1256_s30, 0 }
  0x4b   : > { %s729_s15 = sadd.s32 4294967292, %s146_s11  ;;  %s1019_s4 = smov [#allocation7]  }
  0x4c   : > { %s730_s16 = sadd.s32 4294967292, %s149_s13  ;;  %v168_v5 = vstv %s729_s15  ;;  %p945_p1 = pnand %p944_p9, %p1259_p0 }
  0x4d   : > { %v151_v6 = vstv %s730_s16  ;;  %v169_v7 = vadd.s32 %v168_v5, %v144_v2  ;;  %s947_s5 = sshll.u32 %s1019_s4, 4  ;;  %s948_s5 = int_to_ptr.vmem [resolvable:$false] %s947_s5 }
  0x4e   : > { %v152_v8 = vadd.s32 %v151_v6, %v141_v1  ;;  %v153_v9 = vadd.s32 %v151_v6, %v142_v4  ;;  %p946_p2 = pneg %p945_p1  ;;  %s949_s6 = scalar_lea.vmem %s948_s5, 2048 }
  0x4f   : > { %vm170_vm1 = vcmp.gt.s32.totalorder %v169_v7, 0  ;;  %p950_p11 = scmp.lt.s32.totalorder %s1198_s17, %s948_s5  ;;  %p951_p13 = scmp.lt.s32.totalorder %s949_s6, %s943_s28 }
  0x50   : > { %v171_v10 = vsel %vm170_vm1, %v169_v7, 0  ;;  %vm154_vm6 = vcmp.gt.s32.totalorder %v152_v8, 0  ;;  %vm156_vm7 = vcmp.gt.s32.totalorder %v153_v9, 0 }
  0x51   : > { %vm172_vm2 = vcmp.lt.s32.totalorder %v171_v10, 15  ;;  %v155_v20 = vsel %vm154_vm6, %v152_v8, 0  ;;  %v157_v21 = vsel %vm156_vm7, %v153_v9, 0  ;;  %p952_p3 = por %p951_p13, %p950_p11 }
  0x52   : > { %v173_v11 = vsel %vm172_vm2, %v171_v10, 15  ;;  %vm158_vm8 = vcmp.lt.s32.totalorder %v155_v20, 15  ;;  %vm160_vm9 = vcmp.lt.s32.totalorder %v157_v21, 15 }
  0x53   : > { %vm174_vm3 = vcmp.eq.s32.totalorder %v141_v1, %v173_v11  ;;  %vm175_vm4 = vcmp.eq.s32.totalorder %v142_v4, %v173_v11  ;;  %v159_v22 = vsel %vm158_vm8, %v155_v20, 15  ;;  %v161_v23 = vsel %vm160_vm9, %v157_v21, 15  ;;  %p953_p5 = pnand %p952_p3, %p946_p2 }
  0x54   : > { %vm830_vm5 = vmpackc.low %vm175_vm4, %vm174_vm3  ;;  %vm162_vm10 = vcmp.eq.s32.totalorder %v144_v2, %v159_v22  ;;  %vm163_vm11 = vcmp.eq.s32.totalorder %v144_v2, %v161_v23 }
  0x55   : > { %831 = vmatprep.subr.msk.bf16.mxu0 %vm830_vm5, %v1017_v12  ;;  %v731_v25 = vsel %vm162_vm10, 1.0, %v1018_v24  ;;  %v732_v26 = vsel %vm163_vm11, 1.0, %v1018_v24 }
  0x56   : > { %833 = vmatpush3.bf16.msk.msra.mxu0 %vm830_vm5, %v1017_v12  ;;  %806 = vmatprep.mubr.msk.f32.mxu1 %vm188_vm0, %v731_v25 }
  0x59   : > { %791 = vmatmul.mubr.msk.f32.vlgmr.msra.gmra.mrb[0].mxu0 %vm188_vm0, %v181_v13 }
  0x5a   : > { %793 = vmatprep.mubr.msk.f32.mxu0 %vm188_vm0, %v182_v14 }
  0x5d   : > { %794 = vmatmul.mubr.msk.f32.gmra.mrb[2].mxu0 %vm188_vm0, %v183_v15 }
  0x5e   : > { %796 = vmatprep.mubr.msk.f32.mxu0 %vm188_vm0, %v184_v16 }
  0x61   : > { %797 = vmatmul.mubr.msk.f32.gmra.mrb[4].mxu0 %vm188_vm0, %v185_v17 }
  0x62   : > { %799 = vmatprep.mubr.msk.f32.mxu0 %vm188_vm0, %v186_v18 }
  0x65   : > { %800 = vmatmul.mubr.msk.f32.gmra.mrb[6].mxu0 %vm188_vm0, %v187_v19 }
 0x12c   : > { %v792_v27 = vpop.f32.mrb[0].mxu0 }
 0x12d   : > { %v279_v28 = vpop.f32.mrb[1].mxu0 }
 0x12e   : > { %v834_v29 = vpack.c.bf16 %v792_v27, %v279_v28 }
 0x130   : > { %v795_v30 = vpop.f32.mrb[2].mxu0  ;;  %835 = vmatprep.subr.bf16.mxu1 %v834_v29 }
 0x131   : > { %v289_v31 = vpop.f32.mrb[3].mxu0  ;;  %837 = vmatpush3.bf16.msra.mxu1 %v834_v29 }
 0x132   : > { %v838_v32 = vpack.c.bf16 %v795_v30, %v289_v31 }
 0x134   : > { %v798_v33 = vpop.f32.mrb[4].mxu0  ;;  %807 = vmatmul.mubr.msk.f32.vlgmr.msra.gmra.mrb[0].mxu1 %vm188_vm0, %v732_v26  ;;  %839 = vmatprep.subr.bf16.mxu1 %v838_v32 }
 0x135   : > { %v299_v34 = vpop.f32.mrb[5].mxu0  ;;  %841 = vmatpush3.bf16.msra.mxu1 %v838_v32  ;;  %813 = vmatprep.mubr.msk.f32.mxu1 %vm188_vm0, %v731_v25 }
 0x136   : > { %v842_v35 = vpack.c.bf16 %v798_v33, %v299_v34 }
 0x138   : > { %v801_v36 = vpop.f32.mrb[6].mxu0  ;;  %814 = vmatmul.mubr.msk.f32.vlgmr.msra.gmra.mrb[2].mxu1 %vm188_vm0, %v732_v26  ;;  %843 = vmatprep.subr.bf16.mxu1 %v842_v35 }
 0x139   : > { %v309_v37 = vpop.f32.mrb[7].mxu0  ;;  %845 = vmatpush3.bf16.msra.mxu1 %v842_v35  ;;  %820 = vmatprep.mubr.msk.f32.mxu1 %vm188_vm0, %v731_v25 }
 0x13a   : > { %v846_v38 = vpack.c.bf16 %v801_v36, %v309_v37 }
 0x13c   : > { %821 = vmatmul.mubr.msk.f32.vlgmr.msra.gmra.mrb[4].mxu1 %vm188_vm0, %v732_v26  ;;  %847 = vmatprep.subr.bf16.mxu1 %v846_v38 }
 0x13d   : > { %849 = vmatpush3.bf16.msra.mxu1 %v846_v38  ;;  %827 = vmatprep.mubr.msk.f32.mxu1 %vm188_vm0, %v731_v25 }
 0x140   : > { %828 = vmatmul.mubr.msk.f32.vlgmr.msra.gmra.mrb[6].mxu1 %vm188_vm0, %v732_v26 }
 0x207   : > { %v808_v39 = vpop.f32.mrb[0].mxu1 }
 0x208   : > { %625 = vst.msk [vmem:[%s139_s29 + $0x8] sm:$0xff] %vm188_vm0, %v808_v39  ;;  %v390_v40 = vpop.f32.mrb[1].mxu1 }
 0x209   : > { %624 = vst.msk [vmem:[%s139_s29] sm:$0xff] %vm188_vm0, %v390_v40 }
 0x20b   : > { %v815_v41 = vpop.f32.mrb[2].mxu1 }
 0x20c   : > { %627 = vst.msk [vmem:[%s139_s29 + $0x18] sm:$0xff] %vm188_vm0, %v815_v41  ;;  %v465_v42 = vpop.f32.mrb[3].mxu1 }
 0x20d   : > { %626 = vst.msk [vmem:[%s139_s29 + $0x10] sm:$0xff] %vm188_vm0, %v465_v42 }
 0x20f   : > { %v822_v43 = vpop.f32.mrb[4].mxu1 }
 0x210   : > { %629 = vst.msk [vmem:[%s139_s29 + $0x28] sm:$0xff] %vm188_vm0, %v822_v43  ;;  %v540_v44 = vpop.f32.mrb[5].mxu1 }
 0x211   : > { %628 = vst.msk [vmem:[%s139_s29 + $0x20] sm:$0xff] %vm188_vm0, %v540_v44 }
 0x213   : > { %v829_v45 = vpop.f32.mrb[6].mxu1 }
 0x214   : > { %631 = vst.msk [vmem:[%s139_s29 + $0x38] sm:$0xff] %vm188_vm0, %v829_v45  ;;  %v615_v46 = vpop.f32.mrb[7].mxu1 }
 0x215   : > { %630 = vst.msk [vmem:[%s139_s29 + $0x30] sm:$0xff] %vm188_vm0, %v615_v46 }
 0x216   : > { %956 = shalt.err (!%p953_p5)
}
 0x217   : > { %s957_s8 = scalar_lea.hbm %s1204_s26, 1024  ;;  %s961_s9 = scalar_lea.hbm %s1252_s2, 2048 }
 0x218   : > { %p958_p7 = scmp.ne.s32.totalorder %s1204_s26, %s957_s8  ;;  %p962_p12 = scmp.lt.u32.totalorder %s1204_s26, %s1252_s2 }
 0x219   : > { %p963_p4 = scmp.lt.u32.totalorder %s961_s9, %s957_s8  ;;  %p965_p9 = scmp.lt.u32.totalorder %s957_s8, %s1204_s26 }
 0x21a   : > { %p959_p8 = pnand %p958_p7, %p1259_p0 }
 0x21b   : > { %p964_p6 = por %p963_p4, %p962_p12 }
 0x21c   : > { %p960_p10 = pneg %p959_p8 }
 0x21d   : > { %p966_p1 = por %p965_p9, %p964_p6 }
 0x21f   : > { %p967_p2 = pnand %p966_p1, %p960_p10 }
 0x221   : > { %970 = shalt.err (!%p967_p2)
}
 0x222   : > { %s1020_s13 = smov 128   ;;  %s1021_s15 = smov 8  }
 0x223   : > { %852 = dma.vmem_to_hbm [thread:$0]  (%p1259_p0), %s1198_s17, 1024, %s1204_s26, %s633_s0, %s1020_s13, %s1020_s13, %s1021_s15  }
 0x224 PF: > { %s661_s16 = sand.u32 1, %s999_s19   ;;  %p1260_p11 = scmp.ne.s32.totalorder %s1257_s3, 0 }
 0x225   : > { %p1261_p13 = scmp.ge.s32.totalorder %s1011_s22, 2  ;;  %s662_s29 = scalar_lea.sflag [#allocation6], %s661_s16 }
 0x227   : > { %p859_p3 = pnand %p1261_p13, %p1260_p11 }
 0x229   : > { %994 = dma.done.wait (!%p859_p3), %s662_s29, 1024  }
 0x22a   : > { %996 = vsyncadd (!%p859_p3), %s662_s29, 4294966272  ;;  %p19_p5 = scmp.ge.s32.totalorder %s1074_s24, 4   ;;  %s1262_s19 = smov %s1003_s20 }
 0x22b   : > { %s1263_s20 = smov %s1007_s21  ;;  %s1264_s21 = smov %s1086_s27 }
 0x22c   : > { %s1265_s22 = smov %s1074_s24  ;;  %21 = sbr.rel (!%p19_p5) target bundleno = 17 (0x11), region = 69 }
 0x233   :  { %667 = vsyncpa [#allocation5], 1 }
 0x234   :  { %669 = vsyncpa [#allocation5 + $0x1], 1 }
 0x235   :  { %670 = vsyncpa [#allocation6], 1 }
 0x236   :  { %672 = vsyncpa [#allocation6 + $0x1], 1 }

</bundles_post_ra>
